<compile_context>
chip_gen: v7x
topology: tpu7x:2x2x1
jax: 0.10.0
libtpu: 0.0.40
codegen_flags: <defaults>
</compile_context>

<pallas_src>
import jax
import jax.numpy as jnp
from jax import lax
from jax.experimental import pallas as pl
from jax.experimental.pallas import tpu as pltpu


def _mlp_kernel(x_ref, w1_ref, w2_ref, beff_ref, o_ref):
    # x_ref:    (BB, T_in, F)        f32  (cast to bf16 in-kernel)
    # w1_ref:   (C_out, F)           bf16
    # w2_ref:   (T_out_k, T_in)      bf16
    # beff_ref: (C_out, T_out_k)     f32
    # o_ref:    (BB, C_out, T_out_k) out_dtype (bf16 by default)
    bb = x_ref.shape[0]
    w1 = w1_ref[...]
    w2 = w2_ref[...]
    beff = beff_ref[...]

    def compute_one(b):
        # Leading-dim index is a free view; cast to bf16 on the VPU in VMEM.
        xb = x_ref[b].astype(jnp.bfloat16)                       # (T_in, F)
        # First linear: contract F (last dim of both operands, MXU-native):
        #   y[c, t] = sum_f w1[c, f] * x[b, t, f]
        y = lax.dot_general(w1, xb, (((1,), (1,)), ((), ())),
                            preferred_element_type=jnp.float32)  # (C_out, T_in)
        # Second linear (time projection); the permute(0,2,1) is free because
        # y is already in (C_out, time) orientation:
        #   z[c, o] = sum_t y[c, t] * w2[o, t]
        z = lax.dot_general(y.astype(jnp.bfloat16), w2,
                            (((1,), (1,)), ((), ())),
                            preferred_element_type=jnp.float32)  # (C_out, T_out_k)
        o_ref[b] = (z + beff).astype(o_ref.dtype)

    if bb <= 8:
        # Short, fixed trip count: plain unroll is fine.
        for b in range(bb):
            compute_one(b)
    else:
        # Larger batch blocks: give the scheduler an explicit (unrolled) loop
        # so live ranges stay bounded.
        def body(b, carry):
            compute_one(b)
            return carry
        lax.fori_loop(0, bb, body, None, unroll=True)


def _pick_batch_block(batch, max_bb):
    """Largest divisor of `batch` that is <= max_bb, preferring >= 4 grid
    steps (so each v7x TensorCore gets >= 2 steps to pipeline), then >= 2,
    then any. Prime batches larger than max_bb fall back to BB=1 — correct,
    but one tiny grid step per batch element."""
    cap = max(1, min(max_bb, batch))
    divisors = [d for d in range(1, cap + 1) if batch % d == 0]
    for min_steps in (4, 2, 1):
        cands = [d for d in divisors if batch // d >= min_steps]
        if cands:
            return max(cands)
    return 1


def linear_mlp_forward(x, w1, b1, w2, b2, *,
                       out_dtype=jnp.bfloat16,
                       max_batch_block=32,
                       vmem_budget_bytes=12 * 1024 * 1024,
                       vmem_limit_bytes=None):
    """x: (B, T_in, F); w1: (C_out, F); b1: (C_out,); w2: (T_out, T_in);
    b2: (T_out,). Returns (B, C_out, T_out) in out_dtype (bf16 by default).

    vmem_budget_bytes is a conservative sizing target that fits every
    generation's default scoped VMEM (v5e 16 MiB). On v6e it can be raised
    (e.g. 64 MiB) together with vmem_limit_bytes to push the batch block up.
    """
    B, T_in, F = x.shape
    C_out = w1.shape[0]
    T_out = w2.shape[0]

    # Lane-dense output padding only when it's cheap (<= 1/8 extra bytes);
    # otherwise keep the true T_out (masked final lane tile) and skip the
    # wrapper slice round-trip over the output.
    rem = (-T_out) % 128
    if rem and rem * 8 <= T_out:
        T_out_k = T_out + rem
        w2_k = jnp.pad(w2, ((0, rem), (0, 0)))
        b2_k = jnp.pad(b2, (0, rem))
    else:
        T_out_k = T_out
        w2_k, b2_k = w2, b2

    # Fold both biases (f32):
    #   (x@w1^T + b1) @ w2^T + b2 = (x@w1^T) @ w2^T + b_eff,
    #   b_eff[c, o] = b1[c] * sum_t w2[o, t] + b2[o]
    # (Computed from f32 w2 while the kernel's second matmul uses bf16 w2 —
    #  intentional and within tolerance.)
    b_eff = (jnp.outer(b1, jnp.sum(w2_k, axis=1)) + b2_k[None, :]).astype(jnp.float32)

    # Weights cast once (tiny); x is NOT pre-cast — the kernel casts it.
    w1_bf = w1.astype(jnp.bfloat16)
    w2_bf = w2_k.astype(jnp.bfloat16)

    # VMEM sizing: double-buffered f32 x block + out block, plus resident
    # (double-buffered by default) weights/bias blocks.
    out_itemsize = jnp.dtype(out_dtype).itemsize
    x_bytes_per_elem = T_in * F * 4
    out_bytes_per_elem = C_out * T_out_k * out_itemsize
    weight_bytes = (C_out * F + T_out_k * T_in) * 2 + C_out * T_out_k * 4
    per_elem = 2 * (x_bytes_per_elem + out_bytes_per_elem)
    max_bb_vmem = max(1, (vmem_budget_bytes - 2 * weight_bytes) // per_elem)

    BB = _pick_batch_block(B, min(max_batch_block, max_bb_vmem))
    grid = (B // BB,)

    cost = pl.CostEstimate(
        flops=2 * B * C_out * T_in * (F + T_out_k),
        transcendentals=0,
        bytes_accessed=B * x_bytes_per_elem + B * out_bytes_per_elem + weight_bytes,
    )

    compiler_params = pltpu.CompilerParams(
        dimension_semantics=("parallel",),
        vmem_limit_bytes=vmem_limit_bytes,
    )

    out = pl.pallas_call(
        _mlp_kernel,
        out_shape=jax.ShapeDtypeStruct((B, C_out, T_out_k), out_dtype),
        grid_spec=pltpu.PrefetchScalarGridSpec(
            num_scalar_prefetch=0,
            grid=grid,
            in_specs=[
                pl.BlockSpec((BB, T_in, F), lambda i: (i, 0, 0)),
                pl.BlockSpec((C_out, F), lambda i: (0, 0)),
                pl.BlockSpec((T_out_k, T_in), lambda i: (0, 0)),
                pl.BlockSpec((C_out, T_out_k), lambda i: (0, 0)),
            ],
            out_specs=pl.BlockSpec((BB, C_out, T_out_k), lambda i: (i, 0, 0)),
        ),
        compiler_params=compiler_params,
        cost_estimate=cost,
    )(x, w1_bf, w2_bf, b_eff)

    if T_out_k != T_out:
        out = out[:, :, :T_out]
    return out


def _reference(x, w1, b1, w2, b2):
    y = jnp.einsum("btf,cf->btc", x, w1) + b1          # Linear(feature -> C_out)
    y = jnp.transpose(y, (0, 2, 1))                    # permute(0, 2, 1)
    z = jnp.einsum("bct,ot->bco", y, w2) + b2          # Linear(T_in -> T_out)
    return z


if __name__ == "__main__":
    # Small shapes consistent with the module (scaled-down defaults
    # feature_dim=512, out_channels=235, timepoint_in=110, timepoint_out=128).
    B = 2
    feature_dim = 64
    out_channels = 48
    timepoint_in = 16
    timepoint_out = 24

    key = jax.random.PRNGKey(0)
    kx, kw1, kb1, kw2, kb2 = jax.random.split(key, 5)

    x = jax.random.normal(kx, (B, timepoint_in, feature_dim), dtype=jnp.float32)

    # Deterministic nn.Linear-style init: U(-1/sqrt(fan_in), 1/sqrt(fan_in))
    lim1 = 1.0 / (feature_dim ** 0.5)
    w1 = jax.random.uniform(kw1, (out_channels, feature_dim),
                            minval=-lim1, maxval=lim1, dtype=jnp.float32)
    b1 = jax.random.uniform(kb1, (out_channels,),
                            minval=-lim1, maxval=lim1, dtype=jnp.float32)

    lim2 = 1.0 / (timepoint_in ** 0.5)
    w2 = jax.random.uniform(kw2, (timepoint_out, timepoint_in),
                            minval=-lim2, maxval=lim2, dtype=jnp.float32)
    b2 = jax.random.uniform(kb2, (timepoint_out,),
                            minval=-lim2, maxval=lim2, dtype=jnp.float32)

    out = linear_mlp_forward(x, w1, b1, w2, b2)
    out = jax.block_until_ready(out)

    ref = _reference(x, w1, b1, w2, b2)
    assert out.shape == (B, out_channels, timepoint_out), out.shape
    # Tolerance reflects bf16 matmul operands + bf16 output (f32 MXU
    # accumulation); the reference is pure f32.
    err = float(jnp.max(jnp.abs(out.astype(jnp.float32) - ref)))
    assert jnp.allclose(out.astype(jnp.float32), ref, atol=1e-1, rtol=1e-1), err

    print("KERNEL_OK")
</pallas_src>

<mosaic_0001>
module attributes {stable_mosaic.version = 11 : i64} {
  func.func @_mlp_kernel(%arg0: i32, %arg1: memref<1x16x64xf32, #tpu.memory_space<vmem>>, %arg2: memref<48x64xbf16, #tpu.memory_space<vmem>>, %arg3: memref<24x16xbf16, #tpu.memory_space<vmem>>, %arg4: memref<48x24xf32, #tpu.memory_space<vmem>>, %arg5: memref<1x48x24xbf16, #tpu.memory_space<vmem>>) attributes {dimension_semantics = [#tpu.dimension_semantics<parallel>], iteration_bounds = array<i64: 2>, scalar_prefetch = 0 : i64, scratch_operands = 0 : i64, tpu.core_type = #tpu.core_type<tc>, window_params = [{transform_indices = @transform_0, window_bounds = array<i64: 1, 16, 64>}, {pipeline_mode = #tpu.pipeline_mode<synchronous>, transform_indices = @transform_1, window_bounds = array<i64: 48, 64>}, {pipeline_mode = #tpu.pipeline_mode<synchronous>, transform_indices = @transform_2, window_bounds = array<i64: 24, 16>}, {pipeline_mode = #tpu.pipeline_mode<synchronous>, transform_indices = @transform_3, window_bounds = array<i64: 48, 24>}, {transform_indices = @transform_4, window_bounds = array<i64: 1, 48, 24>}]} {
    %c0 = arith.constant 0 : index
    %c0_0 = arith.constant 0 : index
    %0 = vector.load %arg2[%c0, %c0_0] : memref<48x64xbf16, #tpu.memory_space<vmem>>, vector<48x64xbf16>
    %c0_1 = arith.constant 0 : index
    %c0_2 = arith.constant 0 : index
    %1 = vector.load %arg3[%c0_1, %c0_2] : memref<24x16xbf16, #tpu.memory_space<vmem>>, vector<24x16xbf16>
    %c0_3 = arith.constant 0 : index
    %c0_4 = arith.constant 0 : index
    %2 = vector.load %arg4[%c0_3, %c0_4] : memref<48x24xf32, #tpu.memory_space<vmem>>, vector<48x24xf32>
    %c0_5 = arith.constant 0 : index
    %c0_6 = arith.constant 0 : index
    %c0_7 = arith.constant 0 : index
    %3 = vector.load %arg1[%c0_5, %c0_6, %c0_7] : memref<1x16x64xf32, #tpu.memory_space<vmem>>, vector<1x16x64xf32>
    %4 = vector.shape_cast %3 : vector<1x16x64xf32> to vector<16x64xf32>
    %5 = arith.truncf %4 : vector<16x64xf32> to vector<16x64xbf16>
    %cst = arith.constant dense<0.000000e+00> : vector<48x16xf32>
    %6 = tpu.matmul %0, %5, %cst {dimension_numbers = #tpu.dot_dimension_numbers<[1], [1], [0], [0], [0, 0, 1, 0], [], []>} : vector<48x64xbf16>, vector<16x64xbf16>, vector<48x16xf32> -> vector<48x16xf32>
    %7 = arith.truncf %6 : vector<48x16xf32> to vector<48x16xbf16>
    %cst_8 = arith.constant dense<0.000000e+00> : vector<48x24xf32>
    %8 = tpu.matmul %7, %1, %cst_8 {dimension_numbers = #tpu.dot_dimension_numbers<[1], [1], [0], [0], [0, 0, 1, 0], [], []>} : vector<48x16xbf16>, vector<24x16xbf16>, vector<48x24xf32> -> vector<48x24xf32>
    %9 = arith.addf %8, %2 : vector<48x24xf32>
    %10 = arith.truncf %9 : vector<48x24xf32> to vector<48x24xbf16>
    %c0_9 = arith.constant 0 : index
    %c0_10 = arith.constant 0 : index
    %c0_11 = arith.constant 0 : index
    %11 = vector.load %arg5[%c0_9, %c0_10, %c0_11] : memref<1x48x24xbf16, #tpu.memory_space<vmem>>, vector<1x48x24xbf16>
    %12 = vector.shape_cast %11 : vector<1x48x24xbf16> to vector<48x24xbf16>
    %13 = vector.shape_cast %10 : vector<48x24xbf16> to vector<1x48x24xbf16>
    tpu.vector_store %arg5[%c0_9, %c0_10, %c0_11], %13 {strides = array<i32>} : memref<1x48x24xbf16, #tpu.memory_space<vmem>>, vector<1x48x24xbf16>,
    return
  }
  func.func @transform_0(%arg0: i32) -> (i32, i32, i32) {
    %c0_i32 = arith.constant 0 : i32
    %c0_i32_0 = arith.constant 0 : i32
    %c0_i32_1 = arith.constant 0 : i32
    return %arg0, %c0_i32, %c0_i32_0 : i32, i32, i32
  }
  func.func @transform_1(%arg0: i32) -> (i32, i32) {
    %c0_i32 = arith.constant 0 : i32
    %c0_i32_0 = arith.constant 0 : i32
    %c0_i32_1 = arith.constant 0 : i32
    return %c0_i32, %c0_i32_0 : i32, i32
  }
  func.func @transform_2(%arg0: i32) -> (i32, i32) {
    %c0_i32 = arith.constant 0 : i32
    %c0_i32_0 = arith.constant 0 : i32
    %c0_i32_1 = arith.constant 0 : i32
    return %c0_i32, %c0_i32_0 : i32, i32
  }
  func.func @transform_3(%arg0: i32) -> (i32, i32) {
    %c0_i32 = arith.constant 0 : i32
    %c0_i32_0 = arith.constant 0 : i32
    %c0_i32_1 = arith.constant 0 : i32
    return %c0_i32, %c0_i32_0 : i32, i32
  }
  func.func @transform_4(%arg0: i32) -> (i32, i32, i32) {
    %c0_i32 = arith.constant 0 : i32
    %c0_i32_0 = arith.constant 0 : i32
    %c0_i32_1 = arith.constant 0 : i32
    return %arg0, %c0_i32, %c0_i32_0 : i32, i32, i32
  }
}

</mosaic_0001>

<bundles_post_ra>
// kernel: tpu_custom_call.1
= control target key start
LH: loop header
LB: loop body
LE: loop exit
PB: predicated region body
PF: predicated region fallthrough
CT: control target
= control target key end

     0   :  { %s596_s15 = smov 0   ;;  %s679_s0 = inlined_call_operand.vmem [shape: f32[2,16,64], index: 0, kind: input, shape index: {}]   ;;  %s680_s1 = inlined_call_operand.vmem [shape: bf16[48,64], index: 1, kind: input, shape index: {}]   ;;  %s681_s2 = inlined_call_operand.vmem [shape: bf16[24,16], index: 2, kind: input, shape index: {}]   ;;  %s682_s3 = inlined_call_operand.vmem [shape: f32[48,24], index: 3, kind: input, shape index: {}]   ;;  %s683_s4 = inlined_call_operand.vmem [shape: bf16[2,48,24], index: 4, kind: output, shape index: {}]  }
   0x1 LB: > { %s472_s16 = sadd.s32 4294967295, %s567_s15   ;;  %p476_p0 = scmp.ge.s32.totalorder %s567_s15, 1  ;;  %s567_s15 = sphi %s596_s15, %s14_s15  }
   0x2   : > { %p162_p1 = scmp.lt.s32.totalorder %s567_s15, 3 }
   0x4   : > { %p163_p2 = pnand %p476_p0, %p162_p1 }
   0x5   : > { %p188_p3 = scmp.lt.s32.totalorder (!%p163_p2), %s472_s16, 1  ;;  %v569_v0 = vmov (!%p163_p2), 0.0   ;;  %vm570_vm0 = vmmov (!%p163_p2), 0   ;;  %vm313_vm1 = vcmask (!%p163_p2), 130048   ;;  %v559_v1 = vld [vmem:[%s681_s2] sm:$0xff] (!%p163_p2)   ;;  %vm232_vm2 = vcmask (!%p163_p2), 523264  }
   0x6   : > { %166 = sbr.rel (%p163_p2) target bundleno = 478 (0x1de), region = 36  ;;  %515 = vmatprep.subr.bf16.mxu0 (!%p163_p2), %v569_v0  ;;  %517 = vmatprep.mubr.msk.bf16.mxu0 (!%p163_p2), %vm570_vm0, %v569_v0  ;;  %v324_v4 = vsel (!%p163_p2), %vm313_vm1, %v559_v1, 0  ;;  %v560_v6 = vld [vmem:[%s681_s2 + $0x8] ss:$0 sps:$4 sm:$0xff] (!%p163_p2)   ;;  %v556_v9 = vld [vmem:[%s680_s1] sm:$0xff] (!%p163_p2)   ;;  %v558_v11 = vld [vmem:[%s680_s1 + $0x10] sm:$0xff] (!%p163_p2)  }
   0x7   : > { %529 = vmatprep.subr.bf16.mxu1 (!%p163_p2), %v569_v0  ;;  %533 = vmatprep.mubr.msk.bf16.mxu1 (!%p163_p2), %vm570_vm0, %v569_v0  ;;  %v327_v8 = vsel (!%p163_p2), %vm313_vm1, %v560_v6, 0  ;;  %v557_v10 = vld [vmem:[%s680_s1 + $0x8] sm:$0xff] (!%p163_p2)   ;;  %v208_v27 = vld [vmem:[%s682_s3] sm:$0xff] (!%p163_p2)  ;;  %vm410_vm3 = vcmask (!%p163_p2), 191488   ;;  %v210_v37 = vld [vmem:[%s682_s3 + $0x10] sm:$0xff] (!%p163_p2) }
   0x8   : > { %530 = vmatpush3.bf16.xpose.msra.mxu1 (!%p163_p2), %v324_v4  ;;  %v209_v29 = vld [vmem:[%s682_s3 + $0x8] sm:$0xff] (!%p163_p2)  ;;  %v211_v39 = vld [vmem:[%s682_s3 + $0x18] sm:$0xff] (!%p163_p2)  ;;  %v212_v47 = vld [vmem:[%s682_s3 + $0x20] sm:$0xff] (!%p163_p2) }
   0x9   : > { %531 = vmatprep.subr.bf16.mxu1 (!%p163_p2), %v569_v0  ;;  %v213_v49 = vld [vmem:[%s682_s3 + $0x28] sm:$0xff] (!%p163_p2) }
   0xd   : > { %s685_s16 = smov (!%p188_p3, %s472_s16), 1 }
   0xe   : > { %s499_s17 = sshll.u32 %s685_s16, 4  ;;  %s545_s5 = smul.u32 24, %s685_s16 }
   0xf   : > { %s192_s22 = scalar_lea.vmem %s679_s0, %s499_s17 }
  0x10   : > { %v214_v2 = vld [vmem:[%s192_s22] sm:$0xff]  ;;  %v215_v3 = vld [vmem:[%s192_s22 + $0x8] sm:$0xff]  ;;  %532 = vmatpush3.bf16.xpose.msra.mxu1 %v327_v8  ;;  %s650_s12 = scalar_lea.vmem %s683_s4, %s545_s5 }
  0x11   : > { %v216_v5 = vpack.c.bf16 %v215_v3, %v214_v2 }
  0x13   : > { %v243_v7 = vsel %vm232_vm2, %v216_v5, 0 }
  0x14   : > { %516 = vmatpush3.bf16.xpose.msra.mxu0 %v243_v7 }
  0x1b   : > { %518 = vmatmul.mubr.msk.bf16.vlgmr.msra.gmra.mrb[0].mxu0 %vm232_vm2, %v556_v9 }
  0x1c   : > { %521 = vmatprep.mubr.msk.bf16.mxu0 %vm570_vm0, %v569_v0 }
  0x23   : > { %522 = vmatmul.mubr.msk.bf16.gmra.mrb[4].mxu0 %vm232_vm2, %v557_v10 }
  0x24   : > { %525 = vmatprep.mubr.msk.bf16.mxu0 %vm570_vm0, %v569_v0 }
  0x2b   : > { %526 = vmatmul.mubr.msk.bf16.gmra.mrb[8].mxu0 %vm232_vm2, %v558_v11 }
  0xee   : > { %v279_v12 = vpop.f32.mrb[0].mxu0 }
  0xef   : > { %v519_v13 = vpop.f32.mrb[1].mxu0 }
  0xf0   : > { %v282_v14 = vpop.f32.mrb[2].mxu0 }
  0xf1   : > { %v302_v15 = vpack.c.bf16 %v282_v14, %v279_v12  ;;  %v520_v16 = vpop.f32.mrb[3].mxu0 }
  0xf3   : > { %534 = vmatmul.mubr.msk.bf16.vlgmr.msra.gmra.mrb[0].mxu1 %vm313_vm1, %v302_v15 }
  0xf4   : > { %537 = vmatprep.mubr.msk.bf16.mxu1 %vm570_vm0, %v569_v0 }
  0xf6   : > { %v287_v17 = vpop.f32.mrb[4].mxu0 }
  0xf7   : > { %v523_v18 = vpop.f32.mrb[5].mxu0 }
  0xf8   : > { %v290_v19 = vpop.f32.mrb[6].mxu0 }
  0xf9   : > { %v303_v20 = vpack.c.bf16 %v290_v19, %v287_v17  ;;  %v524_v21 = vpop.f32.mrb[7].mxu0 }
  0xfb   : > { %538 = vmatmul.mubr.msk.bf16.gmra.mrb[4].mxu1 %vm313_vm1, %v303_v20 }
  0xfc   : > { %541 = vmatprep.mubr.msk.bf16.mxu1 %vm570_vm0, %v569_v0 }
  0xfe   : > { %v295_v22 = vpop.f32.mrb[8].mxu0 }
  0xff   : > { %v527_v23 = vpop.f32.mrb[9].mxu0 }
 0x100   : > { %v298_v24 = vpop.f32.mrb[10].mxu0 }
 0x101   : > { %v304_v25 = vpack.c.bf16 %v298_v24, %v295_v22  ;;  %v528_v26 = vpop.f32.mrb[11].mxu0 }
 0x103   : > { %542 = vmatmul.mubr.msk.bf16.gmra.mrb[8].mxu1 %vm313_vm1, %v304_v25 }
 0x1c6   : > { %v363_v28 = vpop.f32.mrb[0].mxu1 }
 0x1c7   : > { %v364_v30 = vadd.f32 %v363_v28, %v208_v27  ;;  %v535_v31 = vpop.f32.mrb[1].mxu1 }
 0x1c8   : > { %v366_v32 = vpop.f32.mrb[2].mxu1 }
 0x1c9   : > { %v500_v33 = vpack.c.bf16 %v364_v30, %v364_v30  ;;  %v367_v34 = vadd.f32 %v366_v32, %v209_v29  ;;  %v536_v35 = vpop.f32.mrb[3].mxu1 }
 0x1cb   : > { %411 = vst.msk [vmem:[%s650_s12] sm:$0xf] %vm410_vm3, %v500_v33  ;;  %v501_v36 = vpack.c.bf16 %v367_v34, %v367_v34 }
 0x1cd   : > { %412 = vst.msk [vmem:[%s650_s12 + $0x4] sm:$0xf] %vm410_vm3, %v501_v36 }
 0x1ce   : > { %v371_v38 = vpop.f32.mrb[4].mxu1 }
 0x1cf   : > { %v372_v40 = vadd.f32 %v371_v38, %v210_v37  ;;  %v539_v41 = vpop.f32.mrb[5].mxu1 }
 0x1d0   : > { %v374_v42 = vpop.f32.mrb[6].mxu1 }
 0x1d1   : > { %v502_v43 = vpack.c.bf16 %v372_v40, %v372_v40  ;;  %v375_v44 = vadd.f32 %v374_v42, %v211_v39  ;;  %v540_v45 = vpop.f32.mrb[7].mxu1 }
 0x1d3   : > { %413 = vst.msk [vmem:[%s650_s12 + $0x8] sm:$0xf] %vm410_vm3, %v502_v43  ;;  %v503_v46 = vpack.c.bf16 %v375_v44, %v375_v44 }
 0x1d5   : > { %414 = vst.msk [vmem:[%s650_s12 + $0xc] sm:$0xf] %vm410_vm3, %v503_v46 }
 0x1d6   : > { %v379_v48 = vpop.f32.mrb[8].mxu1 }
 0x1d7   : > { %v380_v50 = vadd.f32 %v379_v48, %v212_v47  ;;  %v543_v51 = vpop.f32.mrb[9].mxu1 }
 0x1d8   : > { %v382_v52 = vpop.f32.mrb[10].mxu1 }
 0x1d9   : > { %v504_v53 = vpack.c.bf16 %v380_v50, %v380_v50  ;;  %v383_v54 = vadd.f32 %v382_v52, %v213_v49  ;;  %v544_v55 = vpop.f32.mrb[11].mxu1 }
 0x1db   : > { %415 = vst.msk [vmem:[%s650_s12 + $0x10] sm:$0xf] %vm410_vm3, %v504_v53  ;;  %v505_v56 = vpack.c.bf16 %v383_v54, %v383_v54 }
 0x1dd   : > { %416 = vst.msk [vmem:[%s650_s12 + $0x14] sm:$0xf] %vm410_vm3, %v505_v56 }
 0x1de PF: > { %s14_s15 = sadd.s32 1, %s567_s15  }
 0x1df   : > { %p11_p4 = scmp.ge.s32.totalorder %s14_s15, 4  }
 0x1e1   :  { %13 = sbr.rel (!%p11_p4) target bundleno = 1 (0x1), region = 66 }

</bundles_post_ra>
